<compile_context>
chip_gen: v7x
topology: tpu7x:2x2x1
jax: 0.10.0
libtpu: 0.0.40
codegen_flags: <defaults>
</compile_context>

<pallas_src>
import math
import functools

import jax
import jax.numpy as jnp
from jax import lax
from jax.experimental import pallas as pl
from jax.experimental.pallas import tpu as pltpu


def _round_up(x, n):
    return ((x + n - 1) // n) * n


def _pick_tn(C, D, sub, block_n, itemsize, vmem_budget=8 << 20):
    """Largest lane-dense class tile that keeps 2x (double-buffered) weight
    tiles comfortably inside VMEM."""
    tn = _round_up(max(128, min(block_n, _round_up(C, 128))), 128)
    while tn > 128 and 2 * sub * tn * max(D, 128) * itemsize > vmem_budget:
        tn -= 128
    return tn


def _arc_margin_kernel(x_ref, w_ref, label_ref, out_ref, *,
                       s, cos_m, sin_m, th, mm, sub, tn, easy_margin):
    eps = 1e-12

    # ---- normalize x (f32 reductions, rsqrt-multiply on the EUP) -------------
    x = x_ref[...].astype(jnp.float32)                          # (B, D)
    x_ss = jnp.sum(x * x, axis=-1, keepdims=True)
    x_n = (x * lax.rsqrt(jnp.maximum(x_ss, eps * eps))).astype(x_ref.dtype)

    # ---- per-sub normalized matmul, elementwise max over sub ----------------
    # dot_general contracts dim 1 of both operands -> no transpose before MXU.
    dn = (((1,), (1,)), ((), ()))
    cosine = None
    for j in range(sub):                                        # sub is static & small
        w = w_ref[j].astype(jnp.float32)                        # (TN, D)
        w_ss = jnp.sum(w * w, axis=-1, keepdims=True)
        w_n = (w * lax.rsqrt(jnp.maximum(w_ss, eps * eps))).astype(w_ref.dtype)
        c = lax.dot_general(x_n, w_n, dimension_numbers=dn,
                            preferred_element_type=jnp.float32)  # (B, TN)
        cosine = c if cosine is None else jnp.maximum(cosine, c)

    # ---- ArcFace margin (f32 elementwise) ------------------------------------
    # clip guards fp rounding where cosine^2 may slightly exceed 1 (avoids NaN).
    sine = jnp.sqrt(jnp.clip(1.0 - cosine * cosine, 0.0, 1.0))
    phi = cosine * cos_m - sine * sin_m
    if easy_margin:
        phi = jnp.where(cosine > 0, phi, cosine)
    else:
        phi = jnp.where(cosine - th > 0, phi, cosine - mm)

    # one-hot over GLOBAL class index (this tile covers columns [i*TN, (i+1)*TN)).
    col = (lax.broadcasted_iota(jnp.int32, cosine.shape, 1)
           + pl.program_id(0) * tn)
    is_label = col == label_ref[...]                            # (B, TN) bool

    out_ref[...] = (jnp.where(is_label, phi, cosine) * s).astype(out_ref.dtype)


def arc_margin_product(x, weight, label, *, out_features, s=32.0, m=0.5,
                       sub=1, easy_margin=False, block_n=512,
                       compute_dtype=jnp.bfloat16):
    """ArcMarginProduct.forward, tiled over the class dimension.

    compute_dtype controls the MXU operand dtype (bf16 by default, halving
    weight HBM traffic); pass jnp.float32 for bit-closest fidelity to torch.
    """
    B, D = x.shape
    C_sub, D_w = weight.shape
    assert D == D_w and C_sub == out_features * sub
    C = out_features

    cos_m = math.cos(m)
    sin_m = math.sin(m)
    th = math.cos(math.pi - m)
    mm = math.sin(math.pi - m) * m

    itemsize = jnp.dtype(compute_dtype).itemsize

    # Lane-dense class tiling: TN multiple of 128, classes padded up to C_pad.
    tn = _pick_tn(C, D, sub, block_n, itemsize)
    c_pad = _round_up(C, tn)
    n_tiles = c_pad // tn

    # Re-layout weight (C*sub, D) -> (sub, C_pad, D); row c*sub+j -> [j, c, :].
    w_r = jnp.transpose(weight.reshape(C, sub, D), (1, 0, 2))
    if c_pad != C:
        w_r = jnp.pad(w_r, ((0, 0), (0, c_pad - C), (0, 0)))     # zero rows -> cosine 0
    w_r = w_r.astype(compute_dtype)
    x_c = x.astype(compute_dtype)
    label2d = label.astype(jnp.int32).reshape(B, 1)

    kernel = functools.partial(
        _arc_margin_kernel,
        s=float(s), cos_m=cos_m, sin_m=sin_m, th=th, mm=mm,
        sub=sub, tn=tn, easy_margin=easy_margin)

    cost = pl.CostEstimate(
        flops=2 * B * c_pad * sub * D,
        transcendentals=B * c_pad + c_pad * sub + B * n_tiles,
        bytes_accessed=(sub * c_pad * D * itemsize          # weight (dominant)
                        + B * D * itemsize                   # x
                        + B * c_pad * 4))                    # out

    out = pl.pallas_call(
        kernel,
        out_shape=jax.ShapeDtypeStruct((B, c_pad), jnp.float32),
        grid=(n_tiles,),
        in_specs=[
            pl.BlockSpec((B, D), lambda i: (0, 0)),            # x (block idx constant -> one DMA)
            pl.BlockSpec((sub, tn, D), lambda i: (0, i, 0)),   # weight class tile
            pl.BlockSpec((B, 1), lambda i: (0, 0)),            # label (replicated)
        ],
        out_specs=pl.BlockSpec((B, tn), lambda i: (0, i)),
        compiler_params=pltpu.CompilerParams(
            dimension_semantics=("parallel",)),
        cost_estimate=cost,
    )(x_c, w_r, label2d)

    return out[:, :C]


# ---------------------------------------------------------------------------
# Pure-JAX reference (mirrors the torch module) for correctness checking.
# ---------------------------------------------------------------------------
def _arc_margin_ref(x, weight, label, *, out_features, s, m, sub, easy_margin):
    eps = 1e-12
    xn = x / jnp.maximum(jnp.linalg.norm(x, axis=1, keepdims=True), eps)
    wn = weight / jnp.maximum(jnp.linalg.norm(weight, axis=1, keepdims=True), eps)
    cosine = xn @ wn.T                                           # (B, C*sub)
    if sub > 1:
        cosine = jnp.max(cosine.reshape(-1, out_features, sub), axis=2)
    sine = jnp.sqrt(jnp.clip(1.0 - cosine * cosine, 0.0, 1.0))
    cos_m, sin_m = math.cos(m), math.sin(m)
    th = math.cos(math.pi - m)
    mm = math.sin(math.pi - m) * m
    phi = cosine * cos_m - sine * sin_m
    if easy_margin:
        phi = jnp.where(cosine > 0, phi, cosine)
    else:
        phi = jnp.where(cosine - th > 0, phi, cosine - mm)
    one_hot = jax.nn.one_hot(label, out_features, dtype=cosine.dtype)
    return (one_hot * phi + (1.0 - one_hot) * cosine) * s


if __name__ == "__main__":
    B = 8
    in_features = 128
    out_features = 200

    key = jax.random.PRNGKey(0)
    kx, kw, kl = jax.random.split(key, 3)

    x = jax.random.normal(kx, (B, in_features), dtype=jnp.float32)
    label = jax.random.randint(kl, (B,), 0, out_features, dtype=jnp.int32)

    def xavier_uniform(k, fan_out, fan_in):
        bound = math.sqrt(6.0 / (fan_in + fan_out))
        return jax.random.uniform(k, (fan_out, fan_in), dtype=jnp.float32,
                                  minval=-bound, maxval=bound)

    # ---- sub = 1 (module default), f32 compute: compare against reference ----
    w1 = xavier_uniform(kw, out_features, in_features)
    out1 = arc_margin_product(x, w1, label, out_features=out_features,
                              s=32.0, m=0.5, sub=1, easy_margin=False,
                              compute_dtype=jnp.float32)
    jax.block_until_ready(out1)
    ref1 = _arc_margin_ref(x, w1, label, out_features=out_features,
                           s=32.0, m=0.5, sub=1, easy_margin=False)
    assert out1.shape == (B, out_features)
    assert bool(jnp.all(jnp.isfinite(out1)))
    assert bool(jnp.max(jnp.abs(out1 - ref1)) < 0.2), float(jnp.max(jnp.abs(out1 - ref1)))

    # ---- sub = 2 path (contiguous per-sub matmuls + elementwise max), bf16 ----
    w2 = xavier_uniform(kw, out_features * 2, in_features)
    out2 = arc_margin_product(x, w2, label, out_features=out_features,
                              s=32.0, m=0.5, sub=2, easy_margin=False,
                              compute_dtype=jnp.bfloat16)
    jax.block_until_ready(out2)
    ref2 = _arc_margin_ref(x, w2, label, out_features=out_features,
                           s=32.0, m=0.5, sub=2, easy_margin=False)
    assert out2.shape == (B, out_features)
    assert bool(jnp.all(jnp.isfinite(out2)))
    assert bool(jnp.max(jnp.abs(out2 - ref2)) < 0.6), float(jnp.max(jnp.abs(out2 - ref2)))

    # ---- easy_margin branch, f32 compute -------------------------------------
    out3 = arc_margin_product(x, w1, label, out_features=out_features,
                              s=32.0, m=0.5, sub=1, easy_margin=True,
                              compute_dtype=jnp.float32)
    jax.block_until_ready(out3)
    ref3 = _arc_margin_ref(x, w1, label, out_features=out_features,
                           s=32.0, m=0.5, sub=1, easy_margin=True)
    assert bool(jnp.max(jnp.abs(out3 - ref3)) < 0.2), float(jnp.max(jnp.abs(out3 - ref3)))

    print("KERNEL_OK")
</pallas_src>

<mosaic_0001>
module attributes {stable_mosaic.version = 11 : i64} {
  func.func @_arc_margin_kernel(%arg0: i32, %arg1: memref<8x128xf32, #tpu.memory_space<vmem>>, %arg2: memref<1x256x128xf32, #tpu.memory_space<vmem>>, %arg3: memref<8x1xi32, #tpu.memory_space<vmem>>, %arg4: memref<8x256xf32, #tpu.memory_space<vmem>>) attributes {dimension_semantics = [#tpu.dimension_semantics<parallel>], iteration_bounds = array<i64: 1>, scalar_prefetch = 0 : i64, scratch_operands = 0 : i64, tpu.core_type = #tpu.core_type<tc>, window_params = [{pipeline_mode = #tpu.pipeline_mode<synchronous>, transform_indices = @transform_0, window_bounds = array<i64: 8, 128>}, {transform_indices = @transform_1, window_bounds = array<i64: 1, 256, 128>}, {pipeline_mode = #tpu.pipeline_mode<synchronous>, transform_indices = @transform_2, window_bounds = array<i64: 8, 1>}, {transform_indices = @transform_3, window_bounds = array<i64: 8, 256>}]} {
    %c0 = arith.constant 0 : index
    %c0_0 = arith.constant 0 : index
    %0 = vector.load %arg1[%c0, %c0_0] : memref<8x128xf32, #tpu.memory_space<vmem>>, vector<8x128xf32>
    %1 = arith.mulf %0, %0 : vector<8x128xf32>
    %cst = arith.constant dense<0.000000e+00> : vector<8xf32>
    %2 = vector.multi_reduction <add>, %1, %cst [1] : vector<8x128xf32> to vector<8xf32>
    %3 = vector.shape_cast %2 : vector<8xf32> to vector<8x1xf32>
    %cst_1 = arith.constant 1.000000e-24 : f32
    %4 = vector.broadcast %cst_1 : f32 to vector<8x1xf32>
    %5 = arith.maximumf %3, %4 : vector<8x1xf32>
    %6 = math.rsqrt %5 : vector<8x1xf32>
    %7 = vector.broadcast %6 : vector<8x1xf32> to vector<8x128xf32>
    %8 = arith.mulf %0, %7 : vector<8x128xf32>
    %c0_2 = arith.constant 0 : index
    %c0_3 = arith.constant 0 : index
    %c0_4 = arith.constant 0 : index
    %9 = vector.load %arg2[%c0_2, %c0_3, %c0_4] : memref<1x256x128xf32, #tpu.memory_space<vmem>>, vector<1x256x128xf32>
    %10 = vector.shape_cast %9 : vector<1x256x128xf32> to vector<256x128xf32>
    %11 = arith.mulf %10, %10 : vector<256x128xf32>
    %cst_5 = arith.constant dense<0.000000e+00> : vector<256xf32>
    %12 = vector.multi_reduction <add>, %11, %cst_5 [1] : vector<256x128xf32> to vector<256xf32>
    %13 = vector.shape_cast %12 : vector<256xf32> to vector<256x1xf32>
    %cst_6 = arith.constant 1.000000e-24 : f32
    %14 = vector.broadcast %cst_6 : f32 to vector<256x1xf32>
    %15 = arith.maximumf %13, %14 : vector<256x1xf32>
    %16 = math.rsqrt %15 : vector<256x1xf32>
    %17 = vector.broadcast %16 : vector<256x1xf32> to vector<256x128xf32>
    %18 = arith.mulf %10, %17 : vector<256x128xf32>
    %cst_7 = arith.constant dense<0.000000e+00> : vector<8x256xf32>
    %19 = tpu.matmul %8, %18, %cst_7 {dimension_numbers = #tpu.dot_dimension_numbers<[1], [1], [0], [0], [0, 0, 1, 0], [], []>} : vector<8x128xf32>, vector<256x128xf32>, vector<8x256xf32> -> vector<8x256xf32>
    %20 = arith.mulf %19, %19 : vector<8x256xf32>
    %cst_8 = arith.constant 1.000000e+00 : f32
    %21 = vector.broadcast %cst_8 : f32 to vector<8x256xf32>
    %22 = arith.subf %21, %20 : vector<8x256xf32>
    %cst_9 = arith.constant 0.000000e+00 : f32
    %cst_10 = arith.constant 1.000000e+00 : f32
    %23 = vector.broadcast %cst_9 : f32 to vector<8x256xf32>
    %24 = arith.maximumf %23, %22 : vector<8x256xf32>
    %25 = vector.broadcast %cst_10 : f32 to vector<8x256xf32>
    %26 = arith.minimumf %25, %24 : vector<8x256xf32>
    %27 = math.sqrt %26 : vector<8x256xf32>
    %cst_11 = arith.constant 0.87758255 : f32
    %28 = vector.broadcast %cst_11 : f32 to vector<8x256xf32>
    %29 = arith.mulf %19, %28 : vector<8x256xf32>
    %cst_12 = arith.constant 0.47942555 : f32
    %30 = vector.broadcast %cst_12 : f32 to vector<8x256xf32>
    %31 = arith.mulf %27, %30 : vector<8x256xf32>
    %32 = arith.subf %29, %31 : vector<8x256xf32>
    %cst_13 = arith.constant -0.87758255 : f32
    %33 = vector.broadcast %cst_13 : f32 to vector<8x256xf32>
    %34 = arith.subf %19, %33 : vector<8x256xf32>
    %cst_14 = arith.constant 0.000000e+00 : f32
    %35 = vector.broadcast %cst_14 : f32 to vector<8x256xf32>
    %36 = arith.cmpf ogt, %34, %35 : vector<8x256xf32>
    %cst_15 = arith.constant 0.239712775 : f32
    %37 = vector.broadcast %cst_15 : f32 to vector<8x256xf32>
    %38 = arith.subf %19, %37 : vector<8x256xf32>
    %39 = arith.select %36, %32, %38 : vector<8x256xi1>, vector<8x256xf32>
    %40 = tpu.iota {dimensions = array<i32: 1>} : vector<8x256xi32>
    %c256_i32 = arith.constant 256 : i32
    %41 = arith.muli %arg0, %c256_i32 : i32
    %42 = vector.broadcast %41 : i32 to vector<8x256xi32>
    %43 = arith.addi %40, %42 : vector<8x256xi32>
    %c0_16 = arith.constant 0 : index
    %c0_17 = arith.constant 0 : index
    %44 = vector.load %arg3[%c0_16, %c0_17] : memref<8x1xi32, #tpu.memory_space<vmem>>, vector<8x1xi32>
    %45 = vector.broadcast %44 : vector<8x1xi32> to vector<8x256xi32>
    %46 = arith.cmpi eq, %43, %45 : vector<8x256xi32>
    %47 = arith.select %46, %39, %19 : vector<8x256xi1>, vector<8x256xf32>
    %cst_18 = arith.constant 3.200000e+01 : f32
    %48 = vector.broadcast %cst_18 : f32 to vector<8x256xf32>
    %49 = arith.mulf %47, %48 : vector<8x256xf32>
    %c0_19 = arith.constant 0 : index
    %c0_20 = arith.constant 0 : index
    %50 = vector.load %arg4[%c0_19, %c0_20] : memref<8x256xf32, #tpu.memory_space<vmem>>, vector<8x256xf32>
    tpu.vector_store %arg4[%c0_19, %c0_20], %49 {strides = array<i32>} : memref<8x256xf32, #tpu.memory_space<vmem>>, vector<8x256xf32>,
    return
  }
  func.func @transform_0(%arg0: i32) -> (i32, i32) {
    %c0_i32 = arith.constant 0 : i32
    %c0_i32_0 = arith.constant 0 : i32
    %c0_i32_1 = arith.constant 0 : i32
    return %c0_i32, %c0_i32_0 : i32, i32
  }
  func.func @transform_1(%arg0: i32) -> (i32, i32, i32) {
    %c0_i32 = arith.constant 0 : i32
    %c0_i32_0 = arith.constant 0 : i32
    %c0_i32_1 = arith.constant 0 : i32
    return %c0_i32, %arg0, %c0_i32_0 : i32, i32, i32
  }
  func.func @transform_2(%arg0: i32) -> (i32, i32) {
    %c0_i32 = arith.constant 0 : i32
    %c0_i32_0 = arith.constant 0 : i32
    %c0_i32_1 = arith.constant 0 : i32
    return %c0_i32, %c0_i32_0 : i32, i32
  }
  func.func @transform_3(%arg0: i32) -> (i32, i32) {
    %c0_i32 = arith.constant 0 : i32
    %c0_i32_0 = arith.constant 0 : i32
    return %c0_i32, %arg0 : i32, i32
  }
}

</mosaic_0001>

<bundles_post_ra>
// kernel: tpu_custom_call.1
= control target key start
LH: loop header
LB: loop body
LE: loop exit
PB: predicated region body
PF: predicated region fallthrough
CT: control target
= control target key end

     0   :  { %8 = vsyncpa [#allocation3], 0  ;;  %s816_s0 = inlined_call_operand.vmem [shape: f32[8,128], index: 0, kind: input, shape index: {}]   ;;  %s817_s1 = inlined_call_operand.hbm [shape: f32[1,256,128], index: 1, kind: input, shape index: {}]   ;;  %s818_s2 = inlined_call_operand.vmem [shape: s32[8,1], index: 2, kind: input, shape index: {}]   ;;  %s819_s3 = inlined_call_operand.hbm [shape: f32[8,256], index: 3, kind: output, shape index: {}]  }
   0x1   :  { %9 = vsyncpa [#allocation4], 0  ;;  %s596_s12 = smov [#allocation2]   ;;  %s548_s16 = scalar_lea.hbm %s817_s1, 4096 }
   0x2   :  { %s17_s13 = sshll.u32 %s596_s12, 4  ;;  %p549_p0 = scmp.ne.s32.totalorder %s817_s1, %s548_s16  ;;  %s18_s13 = int_to_ptr.vmem [resolvable:$true] %s17_s13 }
   0x3   :  { %p552_p1 = scmp.lt.u32.totalorder %s548_s16, %s817_s1 }
   0x5   :  { %p554_p2 = pnand %p552_p1, %p549_p0 }
   0x7   :  { %557 = shalt.err (!%p554_p2)
}
   0x8   :  { %s558_s21 = scalar_lea.vmem %s18_s13, 4096  ;;  %p563_p4 = scmp.lt.s32.totalorder %s18_s13, %s18_s13 }
   0x9   :  { %p559_p3 = scmp.ne.s32.totalorder %s18_s13, %s558_s21  ;;  %p564_p5 = scmp.lt.s32.totalorder %s558_s21, %s558_s21 }
   0xb   :  { %p565_p6 = por %p564_p5, %p563_p4 }
   0xd   :  { %p566_p7 = pnand %p565_p6, %p559_p3 }
   0xf   :  { %569 = shalt.err (!%p566_p7)
}
  0x10   :  { %s597_s22 = smov 128   ;;  %s598_s23 = smov 8  }
  0x11   :  { %23 = dma.hbm_to_vmem [thread:$0]  %s817_s1, 4096, %s18_s13, [#allocation3], %s597_s22, %s597_s22, %s598_s23  }
  0x12   :  { %592 = dma.done.wait [#allocation3], 4096  }
  0x13   :  { %593 = vsyncadd [#allocation3], 4294963200  ;;  %v633_v0 = vld [vmem:[#allocation2 + $0x80] sm:$0xff]  ;;  %v637_v2 = vld [vmem:[#allocation2 + $0x88] sm:$0xff] }
  0x14   :  { %v635_v1 = vld [vmem:[#allocation2] sm:$0xff]  ;;  %v84_v3 = vmul.f32 %v633_v0, %v633_v0  ;;  %v643_v5 = vld [vmem:[#allocation2 + $0x8] sm:$0xff]  ;;  %v85_v6 = vmul.f32 %v637_v2, %v637_v2  ;;  %v649_v8 = vld [vmem:[#allocation2 + $0x90] sm:$0xff] }
  0x15   :  { %v68_v4 = vmul.f32 %v635_v1, %v635_v1  ;;  %v69_v7 = vmul.f32 %v643_v5, %v643_v5  ;;  %v651_v9 = vld [vmem:[#allocation2 + $0x98] sm:$0xff]  ;;  %v86_v10 = vmul.f32 %v649_v8, %v649_v8  ;;  %v657_v12 = vld [vmem:[#allocation2 + $0x10] sm:$0xff]  ;;  %v665_v16 = vld [vmem:[#allocation2 + $0xa0] sm:$0xff] }
  0x16   :  { %132 = vadd.xlane.f32.xlu0 %v84_v3  ;;  %v87_v11 = vmul.f32 %v651_v9, %v651_v9  ;;  %v659_v13 = vld [vmem:[#allocation2 + $0x18] sm:$0xff]  ;;  %v70_v14 = vmul.f32 %v657_v12, %v657_v12  ;;  %v667_v17 = vld [vmem:[#allocation2 + $0xa8] sm:$0xff]  ;;  %v88_v18 = vmul.f32 %v665_v16, %v665_v16  ;;  %v673_v20 = vld [vmem:[#allocation2 + $0x20] sm:$0xff] }
  0x17   :  { %100 = vadd.xlane.f32.xlu1 %v68_v4  ;;  %v71_v15 = vmul.f32 %v659_v13, %v659_v13  ;;  %v89_v19 = vmul.f32 %v667_v17, %v667_v17  ;;  %v675_v21 = vld [vmem:[#allocation2 + $0x28] sm:$0xff]  ;;  %v72_v22 = vmul.f32 %v673_v20, %v673_v20  ;;  %v681_v24 = vld [vmem:[#allocation2 + $0xb0] sm:$0xff]  ;;  %v683_v25 = vld [vmem:[#allocation2 + $0xb8] sm:$0xff] }
  0x18   :  { %v73_v23 = vmul.f32 %v675_v21, %v675_v21  ;;  %v90_v26 = vmul.f32 %v681_v24, %v681_v24  ;;  %v91_v27 = vmul.f32 %v683_v25, %v683_v25  ;;  %v689_v28 = vld [vmem:[#allocation2 + $0x30] sm:$0xff]  ;;  %v691_v29 = vld [vmem:[#allocation2 + $0x38] sm:$0xff]  ;;  %v697_v32 = vld [vmem:[#allocation2 + $0xc0] sm:$0xff] }
  0x19   :  { %v74_v30 = vmul.f32 %v689_v28, %v689_v28  ;;  %v75_v31 = vmul.f32 %v691_v29, %v691_v29  ;;  %v699_v33 = vld [vmem:[#allocation2 + $0xc8] sm:$0xff]  ;;  %v92_v34 = vmul.f32 %v697_v32, %v697_v32  ;;  %v705_v36 = vld [vmem:[#allocation2 + $0x40] sm:$0xff]  ;;  %v713_v40 = vld [vmem:[#allocation2 + $0xd0] sm:$0xff] }
  0x1a   :  { %134 = vadd.xlane.f32.xlu0 %v85_v6  ;;  %v93_v35 = vmul.f32 %v699_v33, %v699_v33  ;;  %v707_v37 = vld [vmem:[#allocation2 + $0x48] sm:$0xff]  ;;  %v76_v38 = vmul.f32 %v705_v36, %v705_v36  ;;  %v715_v41 = vld [vmem:[#allocation2 + $0xd8] sm:$0xff]  ;;  %v94_v42 = vmul.f32 %v713_v40, %v713_v40  ;;  %v721_v44 = vld [vmem:[#allocation2 + $0x50] sm:$0xff] }
  0x1b   :  { %102 = vadd.xlane.f32.xlu1 %v69_v7  ;;  %v77_v39 = vmul.f32 %v707_v37, %v707_v37  ;;  %v95_v43 = vmul.f32 %v715_v41, %v715_v41  ;;  %v723_v45 = vld [vmem:[#allocation2 + $0x58] sm:$0xff]  ;;  %v78_v46 = vmul.f32 %v721_v44, %v721_v44  ;;  %v729_v48 = vld [vmem:[#allocation2 + $0xe0] sm:$0xff]  ;;  %v731_v49 = vld [vmem:[#allocation2 + $0xe8] sm:$0xff]  ;;  %v599_v7 = vmov 0  }
  0x1c   :  { %v79_v47 = vmul.f32 %v723_v45, %v723_v45  ;;  %v96_v50 = vmul.f32 %v729_v48, %v729_v48  ;;  %v97_v51 = vmul.f32 %v731_v49, %v731_v49  ;;  %v737_v52 = vld [vmem:[#allocation2 + $0x60] sm:$0xff]  ;;  %v739_v53 = vld [vmem:[#allocation2 + $0x68] sm:$0xff]  ;;  %v745_v56 = vld [vmem:[#allocation2 + $0xf0] sm:$0xff]  ;;  %476 = vset.pattern.permute.xlu1 %v599_v7  ;;  %477 = vset.pattern.permute.xlu0 %v599_v7 }
  0x1d   :  { %v80_v54 = vmul.f32 %v737_v52, %v737_v52  ;;  %v81_v55 = vmul.f32 %v739_v53, %v739_v53  ;;  %v747_v57 = vld [vmem:[#allocation2 + $0xf8] sm:$0xff]  ;;  %v98_v58 = vmul.f32 %v745_v56, %v745_v56  ;;  %v753_v60 = vld [vmem:[#allocation2 + $0x70] sm:$0xff]  ;;  %v764_v3 = vld [vmem:[%s816_s0] sm:$0xff]  ;;  %s600_s0 = smov [#allocation5]  }
  0x1e   :  { %136 = vadd.xlane.f32.xlu0 %v86_v10  ;;  %v99_v59 = vmul.f32 %v747_v57, %v747_v57  ;;  %v755_v61 = vld [vmem:[#allocation2 + $0x78] sm:$0xff]  ;;  %v82_v62 = vmul.f32 %v753_v60, %v753_v60  ;;  %v30_v4 = vmul.f32 %v764_v3, %v764_v3  ;;  %v374_v6 = vld [vmem:[%s818_s2] sm:$0xff]  ;;  %s392_s2 = sshll.u32 %s600_s0, 4  ;;  %s393_s2 = int_to_ptr.vmem [resolvable:$true] %s392_s2 }
  0x1f   :  { %138 = vadd.xlane.f32.xlu1 %v87_v11  ;;  %v83_v63 = vmul.f32 %v755_v61, %v755_v61  ;;  %s570_s29 = scalar_lea.vmem %s393_s2, 256  ;;  %p575_p9 = scmp.lt.s32.totalorder %s393_s2, %s393_s2 }
  0x20   :  { %p571_p8 = scmp.ne.s32.totalorder %s393_s2, %s570_s29  ;;  %p576_p10 = scmp.lt.s32.totalorder %s570_s29, %s570_s29 }
  0x22   :  { %104 = vadd.xlane.f32.xlu0 %v70_v14  ;;  %p577_p11 = por %p576_p10, %p575_p9 }
  0x23   :  { %106 = vadd.xlane.f32.xlu1 %v71_v15 }
  0x24   :  { %p578_p12 = pnand %p577_p11, %p571_p8 }
  0x26   :  { %140 = vadd.xlane.f32.xlu0 %v88_v18 }
  0x27   :  { %142 = vadd.xlane.f32.xlu1 %v89_v19 }
  0x2a   :  { %108 = vadd.xlane.f32.xlu0 %v72_v22 }
  0x2b   :  { %110 = vadd.xlane.f32.xlu1 %v73_v23 }
  0x2e   :  { %144 = vadd.xlane.f32.xlu0 %v90_v26 }
  0x2f   :  { %146 = vadd.xlane.f32.xlu1 %v91_v27 }
  0x32   :  { %112 = vadd.xlane.f32.xlu0 %v74_v30 }
  0x33   :  { %114 = vadd.xlane.f32.xlu1 %v75_v31 }
  0x36   :  { %148 = vadd.xlane.f32.xlu0 %v92_v34 }
  0x37   :  { %150 = vadd.xlane.f32.xlu1 %v93_v35 }
  0x3a   :  { %116 = vadd.xlane.f32.xlu0 %v76_v38 }
  0x3b   :  { %118 = vadd.xlane.f32.xlu1 %v77_v39 }
  0x3e   :  { %152 = vadd.xlane.f32.xlu0 %v94_v42 }
  0x3f   :  { %154 = vadd.xlane.f32.xlu1 %v95_v43 }
  0x42   :  { %120 = vadd.xlane.f32.xlu0 %v78_v46 }
  0x43   :  { %122 = vadd.xlane.f32.xlu1 %v79_v47 }
  0x46   :  { %156 = vadd.xlane.f32.xlu0 %v96_v50 }
  0x47   :  { %158 = vadd.xlane.f32.xlu1 %v97_v51 }
  0x4a   :  { %124 = vadd.xlane.f32.xlu0 %v80_v54 }
  0x4b   :  { %126 = vadd.xlane.f32.xlu1 %v81_v55 }
  0x4e   :  { %160 = vadd.xlane.f32.xlu0 %v98_v58 }
  0x4f   :  { %162 = vadd.xlane.f32.xlu1 %v99_v59 }
  0x52   :  { %128 = vadd.xlane.f32.xlu0 %v82_v62 }
  0x53   :  { %130 = vadd.xlane.f32.xlu1 %v83_v63 }
  0x56   :  { %31 = vadd.xlane.f32.xlu0 %v30_v4 }
  0x64   :  { %376 = vperm.xlu1 %476, %v374_v6  }
  0xa3   :  { %v133_v10 = vpop.xlane.xlu0 %132 }
  0xa4   :  { %v101_v11 = vpop.xlane.xlu1 %100  ;;  %v180_v14 = vmax.f32 %v133_v10, 1e-24 }
  0xa5   :  { %v164_v15 = vmax.f32 %v101_v11, 1e-24 }
  0xa6   :  { %478 = vrsqrt.f32 %v180_v14 }
  0xa7   :  { %v135_v18 = vpop.xlane.xlu0 %134  ;;  %480 = vrsqrt.f32 %v164_v15 }
  0xa8   :  { %v103_v19 = vpop.xlane.xlu1 %102  ;;  %v181_v22 = vmax.f32 %v135_v18, 1e-24 }
  0xa9   :  { %v165_v23 = vmax.f32 %v103_v19, 1e-24 }
  0xaa   :  { %482 = vrsqrt.f32 %v181_v22 }
  0xab   :  { %484 = vrsqrt.f32 %v165_v23  ;;  %v137_v26 = vpop.xlane.xlu0 %136 }
  0xac   :  { %v139_v27 = vpop.xlane.xlu1 %138  ;;  %v182_v30 = vmax.f32 %v137_v26, 1e-24 }
  0xad   :  { %v183_v31 = vmax.f32 %v139_v27, 1e-24 }
  0xae   :  { %486 = vrsqrt.f32 %v182_v30 }
  0xaf   :  { %488 = vrsqrt.f32 %v183_v31  ;;  %v105_v34 = vpop.xlane.xlu0 %104 }
  0xb0   :  { %v107_v35 = vpop.xlane.xlu1 %106  ;;  %v166_v38 = vmax.f32 %v105_v34, 1e-24  ;;  %v479_v42 = vpop.eup %478 }
  0xb1   :  { %v167_v39 = vmax.f32 %v107_v35, 1e-24  ;;  %v481_v43 = vpop.eup %480  ;;  %v244_v58 = vmul.f32 %v479_v42, %v633_v0 }
  0xb2   :  { %490 = vrsqrt.f32 %v166_v38  ;;  %v228_v62 = vmul.f32 %v481_v43, %v635_v1 }
  0xb3   :  { %492 = vrsqrt.f32 %v167_v39  ;;  %v141_v46 = vpop.xlane.xlu0 %140 }
  0xb4   :  { %v143_v47 = vpop.xlane.xlu1 %142  ;;  %v483_v50 = vpop.eup %482  ;;  %v184_v51 = vmax.f32 %v141_v46, 1e-24 }
  0xb5   :  { %v185_v54 = vmax.f32 %v143_v47, 1e-24  ;;  %v485_v55 = vpop.eup %484  ;;  %v245_v59 = vmul.f32 %v483_v50, %v637_v2 }
  0xb6   :  { %494 = vrsqrt.f32 %v184_v51  ;;  %v229_v63 = vmul.f32 %v485_v55, %v643_v5 }
  0xb7   :  { %496 = vrsqrt.f32 %v185_v54  ;;  %v109_v4 = vpop.xlane.xlu0 %108  ;;  %v439_v7 = vpack.c.bf16 %v245_v59, %v244_v58 }
  0xb8   :  { %v111_v6 = vpop.xlane.xlu1 %110  ;;  %v487_v10 = vpop.eup %486  ;;  %v168_v11 = vmax.f32 %v109_v4, 1e-24  ;;  %v441_v15 = vpack.c.bf16 %v229_v63, %v228_v62 }
  0xb9   :  { %v169_v14 = vmax.f32 %v111_v6, 1e-24  ;;  %v489_v18 = vpop.eup %488  ;;  %440 = vmatprep.subr.bf16.mxu0 %v439_v7  ;;  %v246_v19 = vmul.f32 %v487_v10, %v649_v8 }
  0xba   :  { %498 = vrsqrt.f32 %v168_v11  ;;  %442 = vmatpush3.bf16.xpose.msra.mxu0 %v441_v15  ;;  %v247_v0 = vmul.f32 %v489_v18, %v651_v9 }
  0xbb   :  { %500 = vrsqrt.f32 %v169_v14  ;;  %v145_v1 = vpop.xlane.xlu0 %144 }
  0xbc   :  { %v147_v2 = vpop.xlane.xlu1 %146  ;;  %v491_v5 = vpop.eup %490  ;;  %v186_v22 = vmax.f32 %v145_v1, 1e-24  ;;  %v443_v26 = vpack.c.bf16 %v247_v0, %v246_v19 }
  0xbd   :  { %v187_v23 = vmax.f32 %v147_v2, 1e-24  ;;  %v493_v27 = vpop.eup %492  ;;  %v230_v30 = vmul.f32 %v491_v5, %v657_v12 }
  0xbe   :  { %502 = vrsqrt.f32 %v186_v22  ;;  %444 = vmatprep.subr.bf16.mxu0 %v443_v26  ;;  %v231_v31 = vmul.f32 %v493_v27, %v659_v13 }
  0xbf   :  { %504 = vrsqrt.f32 %v187_v23  ;;  %v113_v8 = vpop.xlane.xlu0 %112 }
  0xc0   :  { %v115_v34 = vpop.xlane.xlu1 %114  ;;  %v495_v35 = vpop.eup %494  ;;  %v170_v38 = vmax.f32 %v113_v8, 1e-24  ;;  %v445_v39 = vpack.c.bf16 %v231_v31, %v230_v30 }
  0xc1   :  { %v171_v9 = vmax.f32 %v115_v34, 1e-24  ;;  %v497_v42 = vpop.eup %496  ;;  %v248_v43 = vmul.f32 %v495_v35, %v665_v16 }
  0xc2   :  { %506 = vrsqrt.f32 %v170_v38  ;;  %446 = vmatpush3.bf16.xpose.msra.mxu0 %v445_v39  ;;  %v249_v46 = vmul.f32 %v497_v42, %v667_v17 }
  0xc3   :  { %508 = vrsqrt.f32 %v171_v9  ;;  %v149_v12 = vpop.xlane.xlu0 %148 }
  0xc4   :  { %v151_v47 = vpop.xlane.xlu1 %150  ;;  %v499_v50 = vpop.eup %498  ;;  %v188_v51 = vmax.f32 %v149_v12, 1e-24  ;;  %v447_v54 = vpack.c.bf16 %v249_v46, %v248_v43 }
  0xc5   :  { %v189_v13 = vmax.f32 %v151_v47, 1e-24  ;;  %v501_v55 = vpop.eup %500  ;;  %v232_v58 = vmul.f32 %v499_v50, %v673_v20 }
  0xc6   :  { %510 = vrsqrt.f32 %v188_v51  ;;  %448 = vmatprep.subr.bf16.mxu0 %v447_v54  ;;  %v233_v59 = vmul.f32 %v501_v55, %v675_v21 }
  0xc7   :  { %512 = vrsqrt.f32 %v189_v13  ;;  %v117_v16 = vpop.xlane.xlu0 %116 }
  0xc8   :  { %v119_v62 = vpop.xlane.xlu1 %118  ;;  %v503_v63 = vpop.eup %502  ;;  %v172_v4 = vmax.f32 %v117_v16, 1e-24  ;;  %v449_v6 = vpack.c.bf16 %v233_v59, %v232_v58 }
  0xc9   :  { %v173_v17 = vmax.f32 %v119_v62, 1e-24  ;;  %v505_v7 = vpop.eup %504  ;;  %v250_v10 = vmul.f32 %v503_v63, %v681_v24 }
  0xca   :  { %514 = vrsqrt.f32 %v172_v4  ;;  %450 = vmatpush3.bf16.xpose.msra.mxu0 %v449_v6  ;;  %v251_v11 = vmul.f32 %v505_v7, %v683_v25 }
  0xcb   :  { %516 = vrsqrt.f32 %v173_v17  ;;  %v153_v20 = vpop.xlane.xlu0 %152 }
  0xcc   :  { %v155_v14 = vpop.xlane.xlu1 %154  ;;  %v507_v15 = vpop.eup %506  ;;  %v190_v18 = vmax.f32 %v153_v20, 1e-24  ;;  %v451_v19 = vpack.c.bf16 %v251_v11, %v250_v10 }
  0xcd   :  { %v191_v21 = vmax.f32 %v155_v14, 1e-24  ;;  %v509_v0 = vpop.eup %508  ;;  %v234_v1 = vmul.f32 %v507_v15, %v689_v28 }
  0xce   :  { %518 = vrsqrt.f32 %v190_v18  ;;  %452 = vmatprep.subr.bf16.mxu0 %v451_v19  ;;  %v235_v2 = vmul.f32 %v509_v0, %v691_v29 }
  0xcf   :  { %520 = vrsqrt.f32 %v191_v21  ;;  %v121_v24 = vpop.xlane.xlu0 %120 }
  0xd0   :  { %v123_v5 = vpop.xlane.xlu1 %122  ;;  %v511_v22 = vpop.eup %510  ;;  %v174_v23 = vmax.f32 %v121_v24, 1e-24  ;;  %v453_v26 = vpack.c.bf16 %v235_v2, %v234_v1 }
  0xd1   :  { %v175_v25 = vmax.f32 %v123_v5, 1e-24  ;;  %v513_v27 = vpop.eup %512  ;;  %v252_v30 = vmul.f32 %v511_v22, %v697_v32 }
  0xd2   :  { %522 = vrsqrt.f32 %v174_v23  ;;  %454 = vmatpush3.bf16.xpose.msra.mxu0 %v453_v26  ;;  %v253_v31 = vmul.f32 %v513_v27, %v699_v33 }
  0xd3   :  { %524 = vrsqrt.f32 %v175_v25  ;;  %v157_v28 = vpop.xlane.xlu0 %156 }
  0xd4   :  { %v159_v8 = vpop.xlane.xlu1 %158  ;;  %v515_v34 = vpop.eup %514  ;;  %v192_v35 = vmax.f32 %v157_v28, 1e-24  ;;  %v455_v38 = vpack.c.bf16 %v253_v31, %v252_v30 }
  0xd5   :  { %v193_v29 = vmax.f32 %v159_v8, 1e-24  ;;  %v517_v9 = vpop.eup %516  ;;  %v236_v39 = vmul.f32 %v515_v34, %v705_v36 }
  0xd6   :  { %526 = vrsqrt.f32 %v192_v35  ;;  %456 = vmatprep.subr.bf16.mxu0 %v455_v38  ;;  %v237_v42 = vmul.f32 %v517_v9, %v707_v37 }
  0xd7   :  { %528 = vrsqrt.f32 %v193_v29  ;;  %v125_v32 = vpop.xlane.xlu0 %124 }
  0xd8   :  { %v127_v43 = vpop.xlane.xlu1 %126  ;;  %v519_v46 = vpop.eup %518  ;;  %v176_v12 = vmax.f32 %v125_v32, 1e-24  ;;  %v457_v47 = vpack.c.bf16 %v237_v42, %v236_v39 }
  0xd9   :  { %v177_v33 = vmax.f32 %v127_v43, 1e-24  ;;  %v521_v50 = vpop.eup %520  ;;  %v254_v51 = vmul.f32 %v519_v46, %v713_v40 }
  0xda   :  { %530 = vrsqrt.f32 %v176_v12  ;;  %458 = vmatpush3.bf16.xpose.msra.mxu0 %v457_v47  ;;  %v255_v13 = vmul.f32 %v521_v50, %v715_v41 }
  0xdb   :  { %532 = vrsqrt.f32 %v177_v33  ;;  %v161_v36 = vpop.xlane.xlu0 %160 }
  0xdc   :  { %v163_v54 = vpop.xlane.xlu1 %162  ;;  %v523_v55 = vpop.eup %522  ;;  %v194_v58 = vmax.f32 %v161_v36, 1e-24  ;;  %v459_v59 = vpack.c.bf16 %v255_v13, %v254_v51 }
  0xdd   :  { %v195_v37 = vmax.f32 %v163_v54, 1e-24  ;;  %v525_v16 = vpop.eup %524  ;;  %v238_v62 = vmul.f32 %v523_v55, %v721_v44 }
  0xde   :  { %534 = vrsqrt.f32 %v194_v58  ;;  %460 = vmatprep.subr.bf16.mxu0 %v459_v59  ;;  %v239_v63 = vmul.f32 %v525_v16, %v723_v45 }
  0xdf   :  { %536 = vrsqrt.f32 %v195_v37  ;;  %v129_v40 = vpop.xlane.xlu0 %128 }
  0xe0   :  { %v131_v4 = vpop.xlane.xlu1 %130  ;;  %v527_v17 = vpop.eup %526  ;;  %v178_v6 = vmax.f32 %v129_v40, 1e-24  ;;  %v461_v7 = vpack.c.bf16 %v239_v63, %v238_v62 }
  0xe1   :  { %v179_v41 = vmax.f32 %v131_v4, 1e-24  ;;  %v529_v10 = vpop.eup %528  ;;  %v256_v11 = vmul.f32 %v527_v17, %v729_v48 }
  0xe2   :  { %538 = vrsqrt.f32 %v178_v6  ;;  %462 = vmatpush3.bf16.xpose.msra.mxu0 %v461_v7  ;;  %v257_v20 = vmul.f32 %v529_v10, %v731_v49 }
  0xe3   :  { %540 = vrsqrt.f32 %v179_v41  ;;  %v32_v44 = vpop.xlane.xlu0 %31 }
  0xe4   :  { %v531_v14 = vpop.eup %530  ;;  %v463_v15 = vpack.c.bf16 %v257_v20, %v256_v11  ;;  %v33_v18 = vmax.f32 %v32_v44, 1e-24  ;;  %v377_v33 = vpop.permute.xlu1 %376 }
  0xe5   :  { %v533_v45 = vpop.eup %532  ;;  %v240_v21 = vmul.f32 %v531_v14, %v737_v52 }
  0xe6   :  { %464 = vmatprep.subr.bf16.mxu0 %v463_v15  ;;  %542 = vrsqrt.f32 %v33_v18  ;;  %v241_v19 = vmul.f32 %v533_v45, %v739_v53 }
  0xe8   :  { %v535_v0 = vpop.eup %534  ;;  %v465_v1 = vpack.c.bf16 %v241_v19, %v240_v21 }
  0xe9   :  { %v537_v2 = vpop.eup %536  ;;  %v258_v48 = vmul.f32 %v535_v0, %v745_v56 }
  0xea   :  { %466 = vmatpush3.bf16.xpose.msra.mxu0 %v465_v1  ;;  %v259_v49 = vmul.f32 %v537_v2, %v747_v57 }
  0xec   :  { %v539_v24 = vpop.eup %538  ;;  %v467_v5 = vpack.c.bf16 %v259_v49, %v258_v48 }
  0xed   :  { %v541_v22 = vpop.eup %540  ;;  %v242_v23 = vmul.f32 %v539_v24, %v753_v60 }
  0xee   :  { %468 = vmatprep.subr.bf16.mxu0 %v467_v5  ;;  %v243_v52 = vmul.f32 %v541_v22, %v755_v61  ;;  %v367_v61 = vlaneseq }
  0xf0   :  { %v543_v25 = vpop.eup %542  ;;  %v469_v26 = vpack.c.bf16 %v243_v52, %v242_v23  ;;  %v368_v29 = vand.u32 127, %v367_v61 }
  0xf1   :  { %v35_v53 = vmul.f32 %v543_v25, %v764_v3 }
  0xf2   :  { %470 = vmatpush3.bf16.xpose.msra.mxu0 %v469_v26  ;;  %v369_v42 = vadd.s32 128, %v368_v29  ;;  %vm378_vm4 = vcmp.eq.s32.totalorder %v368_v29, %v377_v33 }
  0xf3   :  { %437 = vmatprep.mubr.f32.mxu0 %v35_v53 }
  0xf4   :  { %vm379_vm6 = vcmp.eq.s32.totalorder %v369_v42, %v377_v33 }
  0xf9   :  { %438 = vmatmul.mubr.f32.vlgmr.msra.gmra.mrb[0].mxu0 %v35_v53 }
 0x1cc   :  { %v326_v27 = vpop.f32.mrb[0].mxu0 }
 0x1cd   :  { %v331_v56 = vmul.f32 %v326_v27, %v326_v27  ;;  %v328_v30 = vpop.f32.mrb[1].mxu0  ;;  %v401_v50 = vadd.f32 0.87758255, %v326_v27  ;;  %v353_v51 = vmul.f32 0.87758255, %v326_v27 }
 0x1ce   :  { %v332_v31 = vmul.f32 %v328_v30, %v328_v30  ;;  %v402_v36 = vadd.f32 0.87758255, %v328_v30  ;;  %v354_v55 = vmul.f32 0.87758255, %v328_v30  ;;  %v403_v37 = vadd.f32 -0.23971277, %v326_v27 }
 0x1cf   :  { %v333_v57 = vsub.f32 1.0, %v331_v56  ;;  %v404_v62 = vadd.f32 -0.23971277, %v328_v30  ;;  %vm361_vm5 = vcmp.gt.f32.partialorder %v401_v50, 0.0 }
 0x1d0   :  { %v334_v28 = vsub.f32 1.0, %v332_v31  ;;  %vm362_vm7 = vcmp.gt.f32.partialorder %v402_v36, 0.0 }
 0x1d1   :  { %v335_v8 = vmax.f32 %v333_v57, 0.0 }
 0x1d2   :  { %v336_v34 = vmax.f32 %v334_v28, 0.0 }
 0x1d3   :  { %v337_v35 = vmin.f32 %v335_v8, 1.0 }
 0x1d4   :  { %v338_v60 = vmin.f32 %v336_v34, 1.0 }
 0x1d5   :  { %544 = vrsqrt.f32 %v337_v35  ;;  %vm341_vm0 = vcmp.eq.f32.partialorder %v337_v35, inf  ;;  %v344_v32 = vand.u32 2147483648, %v337_v35  ;;  %vm343_vm2 = vcmp.eq.f32.partialorder %v337_v35, 0.0 }
 0x1d6   :  { %546 = vrsqrt.f32 %v338_v60  ;;  %vm348_vm1 = vcmp.eq.f32.partialorder %v338_v60, inf  ;;  %v351_v43 = vand.u32 2147483648, %v338_v60  ;;  %vm350_vm3 = vcmp.eq.f32.partialorder %v338_v60, 0.0 }
 0x1df   :  { %v545_v38 = vpop.eup %544 }
 0x1e0   :  { %v547_v9 = vpop.eup %546  ;;  %v340_v3 = vmul.f32 %v545_v38, %v337_v35 }
 0x1e1   :  { %v347_v39 = vmul.f32 %v547_v9, %v338_v60 }
 0x1e2   :  { %v342_v46 = vsel %vm341_vm0, %v337_v35, %v340_v3 }
 0x1e3   :  { %v349_v12 = vsel %vm348_vm1, %v338_v60, %v347_v39  ;;  %v345_v47 = vsel %vm343_vm2, %v344_v32, %v342_v46 }
 0x1e4   :  { %v352_v13 = vsel %vm350_vm3, %v351_v43, %v349_v12  ;;  %v355_v54 = vmul.f32 0.47942555, %v345_v47 }
 0x1e5   :  { %v356_v58 = vmul.f32 0.47942555, %v352_v13 }
 0x1e6   :  { %v357_v59 = vsub.f32 %v353_v51, %v355_v54 }
 0x1e7   :  { %v358_v16 = vsub.f32 %v354_v55, %v356_v58 }
 0x1e8   :  { %v365_v63 = vsel %vm361_vm5, %v357_v59, %v403_v37 }
 0x1e9   :  { %v366_v40 = vsel %vm362_vm7, %v358_v16, %v404_v62  ;;  %v380_v4 = vsel %vm378_vm4, %v365_v63, %v326_v27 }
 0x1ea   :  { %v381_v17 = vsel %vm379_vm6, %v366_v40, %v328_v30  ;;  %v382_v6 = vmul.f32 32.0, %v380_v4 }
 0x1eb   :  { %v383_v41 = vmul.f32 32.0, %v381_v17 }
 0x1ec   :  { %384 = vst [vmem:[#allocation5] sm:$0xff] %v382_v6 }
 0x1ed   :  { %385 = vst [vmem:[#allocation5 + $0x8] sm:$0xff] %v383_v41 }
 0x1ee   :  { %581 = shalt.err (!%p578_p12)
}
 0x1ef   :  { %s582_s5 = scalar_lea.hbm %s819_s3, 256 }
 0x1f0   :  { %p583_p13 = scmp.ne.s32.totalorder %s819_s3, %s582_s5  ;;  %p586_p0 = scmp.lt.u32.totalorder %s582_s5, %s819_s3 }
 0x1f2   :  { %p588_p1 = pnand %p586_p0, %p583_p13 }
 0x1f4   :  { %591 = shalt.err (!%p588_p1)
}
 0x1f5   :  { %395 = dma.vmem_to_hbm [thread:$0]  %s393_s2, 256, %s819_s3, [#allocation4]  }
 0x1f6   :  { %594 = dma.done.wait [#allocation4], 256  }
 0x1f7   :  { %595 = vsyncadd [#allocation4], 4294967040 }
 0x1f8   :  { %399 = vsyncpa [#allocation3], 1 }
 0x1f9   :  { %400 = vsyncpa [#allocation4], 1 }

</bundles_post_ra>
